<compile_context>
chip_gen: v7x
topology: tpu7x:2x2x1
jax: 0.10.0
libtpu: 0.0.40
codegen_flags: <defaults>
</compile_context>

<pallas_src>
import functools

import jax
import jax.numpy as jnp
from jax.experimental import pallas as pl
from jax.experimental.pallas import tpu as pltpu

# Dropout rates (module references module-level globals dropout1 / dropout2).
DROPOUT1 = 0.2
DROPOUT2 = 0.5

LANE = 128  # vreg lane width


def _round_up(n, m):
    return ((n + m - 1) // m) * m


def _pad_axis(a, axis, target):
    pad = target - a.shape[axis]
    if pad == 0:
        return a
    widths = [(0, 0)] * a.ndim
    widths[axis] = (0, pad)
    return jnp.pad(a, widths)


def _dropout_bits(h, bits, rate):
    """Inverted dropout via integer threshold on raw uint32 bits.
    keep iff bits >= round(rate * 2**32)  =>  P(keep) = 1 - rate,
    matching dropout_layer(): mask * X / (1 - p)."""
    if rate <= 0.0:
        return h
    if rate >= 1.0:
        return jnp.zeros_like(h)
    thresh = jnp.uint32(min(int(round(rate * 2.0 ** 32)), 2 ** 32 - 1))
    scale = jnp.float32(1.0 / (1.0 - rate))
    return jnp.where(bits >= thresh, h * scale, jnp.float32(0.0))


def mlp_kernel(x_ref, w1_ref, b1_ref, w2_ref, b2_ref, w3_ref, b3_ref, *rest,
               training):
    if training:
        bits1_ref, bits2_ref, o_ref = rest
    else:
        (o_ref,) = rest

    x = x_ref[...]  # bf16 [TILE_B, num_inputs]

    # lin1 + ReLU (+ dropout1): bf16 MXU operands, f32 accumulate & elementwise.
    h1 = jnp.dot(x, w1_ref[...], preferred_element_type=jnp.float32) + b1_ref[...]
    h1 = jnp.maximum(h1, 0.0)
    if training:
        h1 = _dropout_bits(h1, bits1_ref[...], DROPOUT1)
    h1 = h1.astype(jnp.bfloat16)

    # lin2 + ReLU (+ dropout2)
    h2 = jnp.dot(h1, w2_ref[...], preferred_element_type=jnp.float32) + b2_ref[...]
    h2 = jnp.maximum(h2, 0.0)
    if training:
        h2 = _dropout_bits(h2, bits2_ref[...], DROPOUT2)
    h2 = h2.astype(jnp.bfloat16)

    # lin3 — lane-dense (padded to 128) output store.
    out = jnp.dot(h2, w3_ref[...], preferred_element_type=jnp.float32) + b3_ref[...]
    o_ref[...] = out


def prepare_params(params):
    """One-time parameter prep, hoisted out of the per-call path:
    transpose PyTorch [out, in] -> [in, out], zero-pad hidden/output feature
    dims to multiples of 128 (lane-dense), cast matmul operands to bf16."""
    w1, b1, w2, b2, w3, b3 = params
    h1p = _round_up(w1.shape[0], LANE)
    h2p = _round_up(w2.shape[0], LANE)
    outp = _round_up(w3.shape[0], LANE)

    w1t = _pad_axis(w1.T, 1, h1p).astype(jnp.bfloat16)
    w2t = _pad_axis(_pad_axis(w2.T, 0, h1p), 1, h2p).astype(jnp.bfloat16)
    w3t = _pad_axis(_pad_axis(w3.T, 0, h2p), 1, outp).astype(jnp.bfloat16)
    b1r = _pad_axis(b1.reshape(1, -1), 1, h1p).astype(jnp.float32)
    b2r = _pad_axis(b2.reshape(1, -1), 1, h2p).astype(jnp.float32)
    b3r = _pad_axis(b3.reshape(1, -1), 1, outp).astype(jnp.float32)
    return (w1t, b1r, w2t, b2r, w3t, b3r)


def net_forward(x, prepped, *, num_inputs, num_outputs, training=True,
                rng_key=None, tile_b=256):
    """Pallas-backed forward pass of Net (batch-tiled, pipelined)."""
    w1t, b1r, w2t, b2r, w3t, b3r = prepped
    h1p, h2p, outp = w1t.shape[1], w2t.shape[1], w3t.shape[1]

    xf = x.reshape((-1, num_inputs)).astype(jnp.bfloat16)
    batch = xf.shape[0]

    # Batch tile: multiple of 8 sublanes, capped at tile_b (256 keeps
    # 2x-buffered x/bits/out tiles far under even v5e's 16 MiB scoped VMEM).
    tile_b = min(tile_b, _round_up(batch, 8))
    batch_p = _round_up(batch, tile_b)
    xf = _pad_axis(xf, 0, batch_p)
    grid = (batch_p // tile_b,)

    in_specs = [
        pl.BlockSpec((tile_b, num_inputs), lambda i: (i, 0)),  # x: streamed
        pl.BlockSpec((w1t.shape[0], h1p), lambda i: (0, 0)),   # weights/biases
        pl.BlockSpec((1, h1p), lambda i: (0, 0)),              # stay resident
        pl.BlockSpec((h1p, h2p), lambda i: (0, 0)),
        pl.BlockSpec((1, h2p), lambda i: (0, 0)),
        pl.BlockSpec((h2p, outp), lambda i: (0, 0)),
        pl.BlockSpec((1, outp), lambda i: (0, 0)),
    ]
    args = [xf, w1t, b1r, w2t, b2r, w3t, b3r]

    if training:
        # TODO(synk): on real TPU the on-chip PRNG (pltpu.prng_seed /
        # prng_random_bits, seeded per-tile with pl.program_id) would avoid
        # streaming these bits from HBM, but it has no interpret/CPU lowering.
        if rng_key is None:
            rng_key = jax.random.PRNGKey(0)
        k1, k2 = jax.random.split(rng_key)
        bits1 = jax.random.bits(k1, (batch_p, h1p), dtype=jnp.uint32)
        bits2 = jax.random.bits(k2, (batch_p, h2p), dtype=jnp.uint32)
        in_specs += [pl.BlockSpec((tile_b, h1p), lambda i: (i, 0)),
                     pl.BlockSpec((tile_b, h2p), lambda i: (i, 0))]
        args += [bits1, bits2]

    out = pl.pallas_call(
        functools.partial(mlp_kernel, training=training),
        out_shape=jax.ShapeDtypeStruct((batch_p, outp), jnp.float32),
        grid=grid,
        in_specs=in_specs,
        out_specs=pl.BlockSpec((tile_b, outp), lambda i: (i, 0)),
        compiler_params=pltpu.CompilerParams(
            dimension_semantics=("parallel",)),  # 2-TC sharding on v7x
    )(*args)

    return out[:batch, :num_outputs]


def init_params(key, num_inputs, num_hiddens1, num_hiddens2, num_outputs):
    """Deterministic init mimicking nn.Linear default (uniform ±1/sqrt(fan_in))."""
    ks = jax.random.split(key, 6)

    def lin(kw, kb, fan_in, fan_out):
        bound = 1.0 / jnp.sqrt(fan_in)
        w = jax.random.uniform(kw, (fan_out, fan_in), jnp.float32, -bound, bound)
        b = jax.random.uniform(kb, (fan_out,), jnp.float32, -bound, bound)
        return w, b

    w1, b1 = lin(ks[0], ks[1], num_inputs, num_hiddens1)
    w2, b2 = lin(ks[2], ks[3], num_hiddens1, num_hiddens2)
    w3, b3 = lin(ks[4], ks[5], num_hiddens2, num_outputs)
    return (w1, b1, w2, b2, w3, b3)


if __name__ == "__main__":
    # Small shapes consistent with the module: MLP over flattened features.
    batch = 8
    num_inputs, num_hiddens1, num_hiddens2, num_outputs = 32, 64, 64, 16

    key = jax.random.PRNGKey(0)
    kx, kp, kd = jax.random.split(key, 3)
    x = jax.random.normal(kx, (batch, num_inputs), dtype=jnp.float32)
    params = init_params(kp, num_inputs, num_hiddens1, num_hiddens2, num_outputs)
    prepped = prepare_params(params)  # one-time: transpose + pad + bf16 cast

    # Training-mode forward (with in-kernel dropout).
    out_train = net_forward(x, prepped, num_inputs=num_inputs,
                            num_outputs=num_outputs, training=True, rng_key=kd)
    jax.block_until_ready(out_train)

    # Eval-mode forward (no dropout).
    out_eval = net_forward(x, prepped, num_inputs=num_inputs,
                           num_outputs=num_outputs, training=False)
    jax.block_until_ready(out_eval)

    assert out_train.shape == (batch, num_outputs)
    assert out_eval.shape == (batch, num_outputs)

    # Reference 1: identical bf16-operand / f32-accumulate math (tight check).
    w1t, b1r, w2t, b2r, w3t, b3r = prepped
    xb = x.astype(jnp.bfloat16)
    r1 = jnp.maximum(jnp.dot(xb, w1t, preferred_element_type=jnp.float32) + b1r,
                     0.0).astype(jnp.bfloat16)
    r2 = jnp.maximum(jnp.dot(r1, w2t, preferred_element_type=jnp.float32) + b2r,
                     0.0).astype(jnp.bfloat16)
    ref_bf16 = (jnp.dot(r2, w3t, preferred_element_type=jnp.float32)
                + b3r)[:, :num_outputs]
    assert jnp.allclose(out_eval, ref_bf16, atol=1e-4, rtol=1e-4)

    # Reference 2: pure-f32 PyTorch-equivalent forward (loose check).
    w1, b1, w2, b2, w3, b3 = params
    h1 = jnp.maximum(x @ w1.T + b1, 0.0)
    h2 = jnp.maximum(h1 @ w2.T + b2, 0.0)
    ref_f32 = h2 @ w3.T + b3
    assert jnp.allclose(out_eval, ref_f32, atol=2e-2, rtol=2e-2)

    print("KERNEL_OK")
</pallas_src>

<mosaic_0001>
module attributes {stable_mosaic.version = 11 : i64} {
  func.func @mlp_kernel(%arg0: i32, %arg1: memref<8x32xbf16, #tpu.memory_space<vmem>>, %arg2: memref<32x128xbf16, #tpu.memory_space<vmem>>, %arg3: memref<1x128xf32, #tpu.memory_space<vmem>>, %arg4: memref<128x128xbf16, #tpu.memory_space<vmem>>, %arg5: memref<1x128xf32, #tpu.memory_space<vmem>>, %arg6: memref<128x128xbf16, #tpu.memory_space<vmem>>, %arg7: memref<1x128xf32, #tpu.memory_space<vmem>>, %arg8: memref<8x128xi32, #tpu.memory_space<vmem>>, %arg9: memref<8x128xi32, #tpu.memory_space<vmem>>, %arg10: memref<8x128xf32, #tpu.memory_space<vmem>>) attributes {dimension_semantics = [#tpu.dimension_semantics<parallel>], iteration_bounds = array<i64: 1>, scalar_prefetch = 0 : i64, scratch_operands = 0 : i64, tpu.core_type = #tpu.core_type<tc>, window_params = [{transform_indices = @transform_0, window_bounds = array<i64: 8, 32>}, {pipeline_mode = #tpu.pipeline_mode<synchronous>, transform_indices = @transform_1, window_bounds = array<i64: 32, 128>}, {pipeline_mode = #tpu.pipeline_mode<synchronous>, transform_indices = @transform_2, window_bounds = array<i64: 1, 128>}, {pipeline_mode = #tpu.pipeline_mode<synchronous>, transform_indices = @transform_3, window_bounds = array<i64: 128, 128>}, {pipeline_mode = #tpu.pipeline_mode<synchronous>, transform_indices = @transform_4, window_bounds = array<i64: 1, 128>}, {pipeline_mode = #tpu.pipeline_mode<synchronous>, transform_indices = @transform_5, window_bounds = array<i64: 128, 128>}, {pipeline_mode = #tpu.pipeline_mode<synchronous>, transform_indices = @transform_6, window_bounds = array<i64: 1, 128>}, {transform_indices = @transform_7, window_bounds = array<i64: 8, 128>}, {transform_indices = @transform_8, window_bounds = array<i64: 8, 128>}, {transform_indices = @transform_9, window_bounds = array<i64: 8, 128>}]} {
    %c0 = arith.constant 0 : index
    %c0_0 = arith.constant 0 : index
    %0 = vector.load %arg1[%c0, %c0_0] : memref<8x32xbf16, #tpu.memory_space<vmem>>, vector<8x32xbf16>
    %c0_1 = arith.constant 0 : index
    %c0_2 = arith.constant 0 : index
    %1 = vector.load %arg2[%c0_1, %c0_2] : memref<32x128xbf16, #tpu.memory_space<vmem>>, vector<32x128xbf16>
    %cst = arith.constant dense<0.000000e+00> : vector<8x128xf32>
    %2 = tpu.matmul %0, %1, %cst {dimension_numbers = #tpu.dot_dimension_numbers<[1], [0], [0], [1], [0, 0, 1, 1], [], []>} : vector<8x32xbf16>, vector<32x128xbf16>, vector<8x128xf32> -> vector<8x128xf32>
    %c0_3 = arith.constant 0 : index
    %c0_4 = arith.constant 0 : index
    %3 = vector.load %arg3[%c0_3, %c0_4] : memref<1x128xf32, #tpu.memory_space<vmem>>, vector<1x128xf32>
    %4 = vector.broadcast %3 : vector<1x128xf32> to vector<8x128xf32>
    %5 = arith.addf %2, %4 : vector<8x128xf32>
    %cst_5 = arith.constant 0.000000e+00 : f32
    %6 = vector.broadcast %cst_5 : f32 to vector<8x128xf32>
    %7 = arith.maximumf %5, %6 : vector<8x128xf32>
    %c0_6 = arith.constant 0 : index
    %c0_7 = arith.constant 0 : index
    %8 = vector.load %arg8[%c0_6, %c0_7] : memref<8x128xi32, #tpu.memory_space<vmem>>, vector<8x128xi32>
    %c858993459_i32 = arith.constant 858993459 : i32
    %9 = vector.broadcast %c858993459_i32 : i32 to vector<8x128xi32>
    %10 = arith.cmpi uge, %8, %9 : vector<8x128xi32>
    %cst_8 = arith.constant 1.250000e+00 : f32
    %11 = vector.broadcast %cst_8 : f32 to vector<8x128xf32>
    %12 = arith.mulf %7, %11 : vector<8x128xf32>
    %cst_9 = arith.constant 0.000000e+00 : f32
    %13 = vector.broadcast %cst_9 : f32 to vector<8x128xf32>
    %14 = arith.select %10, %12, %13 : vector<8x128xi1>, vector<8x128xf32>
    %15 = arith.truncf %14 : vector<8x128xf32> to vector<8x128xbf16>
    %c0_10 = arith.constant 0 : index
    %c0_11 = arith.constant 0 : index
    %16 = vector.load %arg4[%c0_10, %c0_11] : memref<128x128xbf16, #tpu.memory_space<vmem>>, vector<128x128xbf16>
    %cst_12 = arith.constant dense<0.000000e+00> : vector<8x128xf32>
    %17 = tpu.matmul %15, %16, %cst_12 {dimension_numbers = #tpu.dot_dimension_numbers<[1], [0], [0], [1], [0, 0, 1, 1], [], []>} : vector<8x128xbf16>, vector<128x128xbf16>, vector<8x128xf32> -> vector<8x128xf32>
    %c0_13 = arith.constant 0 : index
    %c0_14 = arith.constant 0 : index
    %18 = vector.load %arg5[%c0_13, %c0_14] : memref<1x128xf32, #tpu.memory_space<vmem>>, vector<1x128xf32>
    %19 = vector.broadcast %18 : vector<1x128xf32> to vector<8x128xf32>
    %20 = arith.addf %17, %19 : vector<8x128xf32>
    %cst_15 = arith.constant 0.000000e+00 : f32
    %21 = vector.broadcast %cst_15 : f32 to vector<8x128xf32>
    %22 = arith.maximumf %20, %21 : vector<8x128xf32>
    %c0_16 = arith.constant 0 : index
    %c0_17 = arith.constant 0 : index
    %23 = vector.load %arg9[%c0_16, %c0_17] : memref<8x128xi32, #tpu.memory_space<vmem>>, vector<8x128xi32>
    %c-2147483648_i32 = arith.constant -2147483648 : i32
    %24 = vector.broadcast %c-2147483648_i32 : i32 to vector<8x128xi32>
    %25 = arith.cmpi uge, %23, %24 : vector<8x128xi32>
    %cst_18 = arith.constant 2.000000e+00 : f32
    %26 = vector.broadcast %cst_18 : f32 to vector<8x128xf32>
    %27 = arith.mulf %22, %26 : vector<8x128xf32>
    %cst_19 = arith.constant 0.000000e+00 : f32
    %28 = vector.broadcast %cst_19 : f32 to vector<8x128xf32>
    %29 = arith.select %25, %27, %28 : vector<8x128xi1>, vector<8x128xf32>
    %30 = arith.truncf %29 : vector<8x128xf32> to vector<8x128xbf16>
    %c0_20 = arith.constant 0 : index
    %c0_21 = arith.constant 0 : index
    %31 = vector.load %arg6[%c0_20, %c0_21] : memref<128x128xbf16, #tpu.memory_space<vmem>>, vector<128x128xbf16>
    %cst_22 = arith.constant dense<0.000000e+00> : vector<8x128xf32>
    %32 = tpu.matmul %30, %31, %cst_22 {dimension_numbers = #tpu.dot_dimension_numbers<[1], [0], [0], [1], [0, 0, 1, 1], [], []>} : vector<8x128xbf16>, vector<128x128xbf16>, vector<8x128xf32> -> vector<8x128xf32>
    %c0_23 = arith.constant 0 : index
    %c0_24 = arith.constant 0 : index
    %33 = vector.load %arg7[%c0_23, %c0_24] : memref<1x128xf32, #tpu.memory_space<vmem>>, vector<1x128xf32>
    %34 = vector.broadcast %33 : vector<1x128xf32> to vector<8x128xf32>
    %35 = arith.addf %32, %34 : vector<8x128xf32>
    %c0_25 = arith.constant 0 : index
    %c0_26 = arith.constant 0 : index
    %36 = vector.load %arg10[%c0_25, %c0_26] : memref<8x128xf32, #tpu.memory_space<vmem>>, vector<8x128xf32>
    tpu.vector_store %arg10[%c0_25, %c0_26], %35 {strides = array<i32>} : memref<8x128xf32, #tpu.memory_space<vmem>>, vector<8x128xf32>,
    return
  }
  func.func @transform_0(%arg0: i32) -> (i32, i32) {
    %c0_i32 = arith.constant 0 : i32
    %c0_i32_0 = arith.constant 0 : i32
    return %arg0, %c0_i32 : i32, i32
  }
  func.func @transform_1(%arg0: i32) -> (i32, i32) {
    %c0_i32 = arith.constant 0 : i32
    %c0_i32_0 = arith.constant 0 : i32
    %c0_i32_1 = arith.constant 0 : i32
    return %c0_i32, %c0_i32_0 : i32, i32
  }
  func.func @transform_2(%arg0: i32) -> (i32, i32) {
    %c0_i32 = arith.constant 0 : i32
    %c0_i32_0 = arith.constant 0 : i32
    %c0_i32_1 = arith.constant 0 : i32
    return %c0_i32, %c0_i32_0 : i32, i32
  }
  func.func @transform_3(%arg0: i32) -> (i32, i32) {
    %c0_i32 = arith.constant 0 : i32
    %c0_i32_0 = arith.constant 0 : i32
    %c0_i32_1 = arith.constant 0 : i32
    return %c0_i32, %c0_i32_0 : i32, i32
  }
  func.func @transform_4(%arg0: i32) -> (i32, i32) {
    %c0_i32 = arith.constant 0 : i32
    %c0_i32_0 = arith.constant 0 : i32
    %c0_i32_1 = arith.constant 0 : i32
    return %c0_i32, %c0_i32_0 : i32, i32
  }
  func.func @transform_5(%arg0: i32) -> (i32, i32) {
    %c0_i32 = arith.constant 0 : i32
    %c0_i32_0 = arith.constant 0 : i32
    %c0_i32_1 = arith.constant 0 : i32
    return %c0_i32, %c0_i32_0 : i32, i32
  }
  func.func @transform_6(%arg0: i32) -> (i32, i32) {
    %c0_i32 = arith.constant 0 : i32
    %c0_i32_0 = arith.constant 0 : i32
    %c0_i32_1 = arith.constant 0 : i32
    return %c0_i32, %c0_i32_0 : i32, i32
  }
  func.func @transform_7(%arg0: i32) -> (i32, i32) {
    %c0_i32 = arith.constant 0 : i32
    %c0_i32_0 = arith.constant 0 : i32
    return %arg0, %c0_i32 : i32, i32
  }
  func.func @transform_8(%arg0: i32) -> (i32, i32) {
    %c0_i32 = arith.constant 0 : i32
    %c0_i32_0 = arith.constant 0 : i32
    return %arg0, %c0_i32 : i32, i32
  }
  func.func @transform_9(%arg0: i32) -> (i32, i32) {
    %c0_i32 = arith.constant 0 : i32
    %c0_i32_0 = arith.constant 0 : i32
    return %arg0, %c0_i32 : i32, i32
  }
}

</mosaic_0001>

<bundles_post_ra>
// kernel: tpu_custom_call.1
= control target key start
LH: loop header
LB: loop body
LE: loop exit
PB: predicated region body
PF: predicated region fallthrough
CT: control target
= control target key end

     0   :  { %14 = vsyncpa [#allocation3], 0  ;;  %s816_s0 = inlined_call_operand.hbm [shape: bf16[8,32], index: 0, kind: input, shape index: {}]   ;;  %s817_s1 = inlined_call_operand.hbm [shape: bf16[32,128], index: 1, kind: input, shape index: {}]   ;;  %s818_s2 = inlined_call_operand.vmem [shape: f32[1,128], index: 2, kind: input, shape index: {}]   ;;  %s819_s3 = inlined_call_operand.hbm [shape: bf16[128,128], index: 3, kind: input, shape index: {}]   ;;  %s820_s4 = inlined_call_operand.vmem [shape: f32[1,128], index: 4, kind: input, shape index: {}]   ;;  %s821_s5 = inlined_call_operand.hbm [shape: bf16[128,128], index: 5, kind: input, shape index: {}]   ;;  %s822_s6 = inlined_call_operand.vmem [shape: f32[1,128], index: 6, kind: input, shape index: {}]   ;;  %s823_s7 = inlined_call_operand.vmem [shape: u32[8,128], index: 7, kind: input, shape index: {}]   ;;  %s824_s8 = inlined_call_operand.vmem [shape: u32[8,128], index: 8, kind: input, shape index: {}]   ;;  %s825_s9 = inlined_call_operand.hbm [shape: f32[8,128], index: 9, kind: output, shape index: {}]  }
   0x1   :  { %15 = vsyncpa [#allocation6], 0 }
   0x2   :  { %16 = vsyncpa [#allocation9], 0 }
   0x3   :  { %17 = vsyncpa [#allocation4], 0  ;;  %s649_s30 = smov [#allocation5]   ;;  %s531_s13 = scalar_lea.hbm %s817_s1, 256 }
   0x4   :  { %s33_s10 = sshll.u32 %s649_s30, 4  ;;  %p532_p0 = scmp.ne.s32.totalorder %s817_s1, %s531_s13  ;;  %s34_s10 = int_to_ptr.vmem [resolvable:$true] %s33_s10 }
   0x5   :  { %p535_p1 = scmp.lt.u32.totalorder %s531_s13, %s817_s1 }
   0x7   :  { %p537_p2 = pnand %p535_p1, %p532_p0 }
   0x9   :  { %540 = shalt.err (!%p537_p2)
}
   0xa   :  { %s541_s18 = scalar_lea.vmem %s34_s10, 256  ;;  %p546_p4 = scmp.lt.s32.totalorder %s34_s10, %s34_s10 }
   0xb   :  { %p542_p3 = scmp.ne.s32.totalorder %s34_s10, %s541_s18  ;;  %p547_p5 = scmp.lt.s32.totalorder %s541_s18, %s541_s18 }
   0xd   :  { %p548_p6 = por %p547_p5, %p546_p4 }
   0xf   :  { %p549_p7 = pnand %p548_p6, %p542_p3 }
  0x11   :  { %552 = shalt.err (!%p549_p7)
}
  0x12   :  { %s650_s19 = smov 64   ;;  %s651_s20 = smov 4  }
  0x13   :  { %39 = dma.hbm_to_vmem [thread:$0]  %s817_s1, 256, %s34_s10, [#allocation6], %s650_s19, %s650_s19, %s651_s20  }
  0x14   :  { %s652_s23 = smov [#allocation2]   ;;  %s653_s25 = smov [#allocation7]  }
  0x15   :  { %s24_s24 = sshll.u32 %s652_s23, 4  ;;  %s47_s26 = sshll.u32 %s653_s25, 4  ;;  %s25_s24 = int_to_ptr.vmem [resolvable:$true] %s24_s24  ;;  %s48_s26 = int_to_ptr.vmem [resolvable:$true] %s47_s26 }
  0x16   :  { %s553_s29 = scalar_lea.hbm %s816_s0, 64 }
  0x17   :  { %p554_p8 = scmp.ne.s32.totalorder %s816_s0, %s553_s29  ;;  %p557_p9 = scmp.lt.u32.totalorder %s553_s29, %s816_s0 }
  0x19   :  { %p559_p10 = pnand %p557_p9, %p554_p8 }
  0x1b   :  { %562 = shalt.err (!%p559_p10)
}
  0x1c   :  { %s563_s1 = scalar_lea.vmem %s25_s24, 64  ;;  %p568_p12 = scmp.lt.s32.totalorder %s25_s24, %s25_s24 }
  0x1d   :  { %p564_p11 = scmp.ne.s32.totalorder %s25_s24, %s563_s1  ;;  %p569_p13 = scmp.lt.s32.totalorder %s563_s1, %s563_s1 }
  0x1f   :  { %p570_p0 = por %p569_p13, %p568_p12 }
  0x21   :  { %p571_p1 = pnand %p570_p0, %p564_p11 }
  0x23   :  { %574 = shalt.err (!%p571_p1)
}
  0x24   :  { %27 = dma.hbm_to_vmem [thread:$0]  %s816_s0, 64, %s25_s24, [#allocation3]  }
  0x25   :  { %s575_s17 = scalar_lea.hbm %s819_s3, 1024 }
  0x26   :  { %p576_p2 = scmp.ne.s32.totalorder %s819_s3, %s575_s17  ;;  %p579_p3 = scmp.lt.u32.totalorder %s575_s17, %s819_s3 }
  0x28   :  { %p581_p4 = pnand %p579_p3, %p576_p2 }
  0x2a   :  { %584 = shalt.err (!%p581_p4)
}
  0x2b   :  { %s585_s25 = scalar_lea.vmem %s48_s26, 1024  ;;  %p590_p6 = scmp.lt.s32.totalorder %s48_s26, %s48_s26 }
  0x2c   :  { %p586_p5 = scmp.ne.s32.totalorder %s48_s26, %s585_s25  ;;  %p591_p7 = scmp.lt.s32.totalorder %s585_s25, %s585_s25 }
  0x2e   :  { %p592_p8 = por %p591_p7, %p590_p6 }
  0x30   :  { %p593_p9 = pnand %p592_p8, %p586_p5 }
  0x32   :  { %596 = shalt.err (!%p593_p9)
}
  0x33   :  { %53 = dma.hbm_to_vmem [thread:$0]  %s819_s3, 1024, %s48_s26, [#allocation6], %s650_s19, %s650_s19, %s651_s20  }
  0x34   :  { %s654_s27 = smov [#allocation8]   ;;  %s597_s11 = scalar_lea.hbm %s821_s5, 1024 }
  0x35   :  { %s61_s28 = sshll.u32 %s654_s27, 4  ;;  %p598_p10 = scmp.ne.s32.totalorder %s821_s5, %s597_s11  ;;  %s62_s28 = int_to_ptr.vmem [resolvable:$true] %s61_s28 }
  0x36   :  { %p601_p11 = scmp.lt.u32.totalorder %s597_s11, %s821_s5 }
  0x38   :  { %p603_p12 = pnand %p601_p11, %p598_p10 }
  0x3a   :  { %606 = shalt.err (!%p603_p12)
}
  0x3b   :  { %s607_s14 = scalar_lea.vmem %s62_s28, 1024  ;;  %p612_p0 = scmp.lt.s32.totalorder %s62_s28, %s62_s28 }
  0x3c   :  { %p608_p13 = scmp.ne.s32.totalorder %s62_s28, %s607_s14  ;;  %p613_p1 = scmp.lt.s32.totalorder %s607_s14, %s607_s14 }
  0x3e   :  { %p614_p2 = por %p613_p1, %p612_p0 }
  0x40   :  { %p615_p3 = pnand %p614_p2, %p608_p13 }
  0x42   :  { %618 = shalt.err (!%p615_p3)
}
  0x43   :  { %67 = dma.hbm_to_vmem [thread:$0]  %s821_s5, 1024, %s62_s28, [#allocation9], %s650_s19, %s650_s19, %s651_s20  }
  0x44   :  { %641 = dma.done.wait [#allocation3], 64  }
  0x45   :  { %642 = vsyncadd [#allocation3], 4294967232 }
  0x46   :  { %643 = dma.done.wait [#allocation6], 1280  }
  0x47   :  { %644 = vsyncadd [#allocation6], 4294966016 }
  0x48   :  { %645 = dma.done.wait [#allocation9], 1024  }
  0x49   :  { %646 = vsyncadd [#allocation9], 4294966272  ;;  %v655_v0 = vmov 0.0   ;;  %vm656_vm0 = vmmov 0   ;;  %v513_v1 = vld [vmem:[#allocation5] sm:$0xff]   ;;  %v514_v2 = vld [vmem:[#allocation5 + $0x8] sm:$0xff]  }
  0x4a   :  { %456 = vmatprep.subr.bf16.mxu0 %v655_v0  ;;  %460 = vmatprep.mubr.msk.bf16.mxu0 %vm656_vm0, %v655_v0  ;;  %v515_v3 = vld [vmem:[#allocation7] sm:$0xff]   ;;  %vm111_vm1 = vcmask 261120   ;;  %v516_v4 = vld [vmem:[#allocation7 + $0x8] sm:$0xff]   ;;  %v517_v6 = vld [vmem:[#allocation7 + $0x10] sm:$0xff]  }
  0x4b   :  { %464 = vmatprep.subr.bf16.mxu1 %v655_v0  ;;  %480 = vmatprep.mubr.msk.bf16.mxu1 %vm656_vm0, %v655_v0  ;;  %v87_v5 = vld [vmem:[#allocation2] sm:$0xf]  ;;  %v518_v7 = vld [vmem:[#allocation7 + $0x18] sm:$0xff]   ;;  %v519_v8 = vld [vmem:[#allocation7 + $0x20] sm:$0xff]  }
  0x4c   :  { %457 = vmatpush3.bf16.msra.mxu0 %v513_v1  ;;  %465 = vmatpush3.bf16.msra.mxu1 %v515_v3  ;;  %v520_v9 = vld [vmem:[#allocation7 + $0x28] sm:$0xff]   ;;  %v521_v10 = vld [vmem:[#allocation7 + $0x30] sm:$0xff]   ;;  %v522_v11 = vld [vmem:[#allocation7 + $0x38] sm:$0xff]  }
  0x4d   :  { %458 = vmatprep.subr.bf16.mxu0 %v655_v0  ;;  %466 = vmatprep.subr.bf16.mxu1 %v655_v0  ;;  %v523_v12 = vld [vmem:[#allocation8] sm:$0xff]   ;;  %v524_v13 = vld [vmem:[#allocation8 + $0x8] sm:$0xff]   ;;  %v525_v14 = vld [vmem:[#allocation8 + $0x10] sm:$0xff]  }
  0x4e   :  { %v526_v15 = vld [vmem:[#allocation8 + $0x18] sm:$0xff]   ;;  %v527_v16 = vld [vmem:[#allocation8 + $0x20] sm:$0xff]   ;;  %v528_v17 = vld [vmem:[#allocation8 + $0x28] sm:$0xff]  }
  0x4f   :  { %v407_v18 = vld [vmem:[%s818_s2] ss:$0 sm:$0xff]  ;;  %v529_v28 = vld [vmem:[#allocation8 + $0x30] sm:$0xff]  }
  0x50   :  { %459 = vmatpush3.bf16.msra.mxu0 %v514_v2  ;;  %467 = vmatpush3.bf16.msra.mxu1 %v516_v4  ;;  %v156_v20 = vld [vmem:[%s823_s7] sm:$0xff] }
  0x51   :  { %484 = vmatprep.subr.bf16.mxu0 %v655_v0  ;;  %468 = vmatprep.subr.bf16.mxu1 %v655_v0  ;;  %vm157_vm2 = vcmp.ge.u32.totalorder %v156_v20, 858993459  ;;  %v530_v29 = vld [vmem:[#allocation8 + $0x38] sm:$0xff]  }
  0x52   :  { %vm420_vm3 = vmpackc.low %vm157_vm2, %vm157_vm2  ;;  %v411_v30 = vld [vmem:[%s820_s4] ss:$0 sm:$0xff]  ;;  %s657_s4 = smov [#allocation10]  }
  0x53   :  { %461 = vmatmul.mubr.msk.bf16.vlgmr.msra.gmra.mrb[0].mxu0 %vm111_vm1, %v87_v5  ;;  %v273_v32 = vld [vmem:[%s824_s8] sm:$0xff]  ;;  %s396_s22 = sshll.u32 %s657_s4, 4  ;;  %s397_s22 = int_to_ptr.vmem [resolvable:$true] %s396_s22 }
  0x54   :  { %500 = vmatprep.mubr.msk.bf16.mxu0 %vm656_vm0, %v655_v0  ;;  %469 = vmatpush3.bf16.msra.mxu1 %v517_v6  ;;  %vm274_vm4 = vcmp.ge.u32.totalorder %v273_v32, 2147483648  ;;  %v423_v40 = vld [vmem:[%s822_s6] ss:$0 sm:$0xff]  ;;  %s619_s8 = scalar_lea.vmem %s397_s22, 128  ;;  %p624_p5 = scmp.lt.s32.totalorder %s397_s22, %s397_s22 }
  0x55   :  { %470 = vmatprep.subr.bf16.mxu1 %v655_v0  ;;  %485 = vmatpush3.bf16.msra.mxu0 %v523_v12  ;;  %vm432_vm5 = vmpackc.low %vm274_vm4, %vm274_vm4  ;;  %p620_p4 = scmp.ne.s32.totalorder %s397_s22, %s619_s8  ;;  %p625_p6 = scmp.lt.s32.totalorder %s619_s8, %s619_s8 }
  0x56   :  { %486 = vmatprep.subr.bf16.mxu0 %v655_v0 }
  0x57   :  { %p626_p7 = por %p625_p6, %p624_p5 }
  0x58   :  { %471 = vmatpush3.bf16.msra.mxu1 %v518_v7 }
  0x59   :  { %472 = vmatprep.subr.bf16.mxu1 %v655_v0  ;;  %487 = vmatpush3.bf16.msra.mxu0 %v524_v13  ;;  %p627_p8 = pnand %p626_p7, %p620_p4 }
  0x5a   :  { %488 = vmatprep.subr.bf16.mxu0 %v655_v0 }
  0x5c   :  { %473 = vmatpush3.bf16.msra.mxu1 %v519_v8 }
  0x5d   :  { %474 = vmatprep.subr.bf16.mxu1 %v655_v0  ;;  %489 = vmatpush3.bf16.msra.mxu0 %v525_v14 }
  0x5e   :  { %490 = vmatprep.subr.bf16.mxu0 %v655_v0 }
  0x60   :  { %475 = vmatpush3.bf16.msra.mxu1 %v520_v9 }
  0x61   :  { %476 = vmatprep.subr.bf16.mxu1 %v655_v0  ;;  %491 = vmatpush3.bf16.msra.mxu0 %v526_v15 }
  0x62   :  { %492 = vmatprep.subr.bf16.mxu0 %v655_v0 }
  0x64   :  { %477 = vmatpush3.bf16.msra.mxu1 %v521_v10 }
  0x65   :  { %478 = vmatprep.subr.bf16.mxu1 %v655_v0  ;;  %493 = vmatpush3.bf16.msra.mxu0 %v527_v16 }
  0x66   :  { %494 = vmatprep.subr.bf16.mxu0 %v655_v0 }
  0x68   :  { %479 = vmatpush3.bf16.msra.mxu1 %v522_v11 }
  0x69   :  { %495 = vmatpush3.bf16.msra.mxu0 %v528_v17 }
  0x6a   :  { %496 = vmatprep.subr.bf16.mxu0 %v655_v0 }
  0x6d   :  { %497 = vmatpush3.bf16.msra.mxu0 %v529_v28 }
  0x6e   :  { %498 = vmatprep.subr.bf16.mxu0 %v655_v0 }
  0x71   :  { %499 = vmatpush3.bf16.msra.mxu0 %v530_v29 }
 0x126   :  { %v149_v19 = vpop.f32.mrb[0].mxu0 }
 0x127   :  { %v150_v21 = vadd.f32 %v407_v18, %v149_v19  ;;  %v462_v22 = vpop.f32.mrb[1].mxu0 }
 0x128   :  { %v152_v23 = vpop.f32.mrb[2].mxu0 }
 0x129   :  { %v155_v24 = vmax.f32 %v150_v21, 0.0  ;;  %v463_v25 = vpop.f32.mrb[3].mxu0 }
 0x12b   :  { %v158_v26 = vmul.f32 1.25, %v155_v24 }
 0x12d   :  { %v421_v27 = vpack.c.bf16 %v158_v26, %v158_v26 }
 0x12f   :  { %481 = vmatmul.mubr.msk.bf16.vlgmr.msra.gmra.mrb[0].mxu1 %vm420_vm3, %v421_v27 }
 0x202   :  { %v266_v31 = vpop.f32.mrb[0].mxu1 }
 0x203   :  { %v267_v33 = vadd.f32 %v411_v30, %v266_v31  ;;  %v482_v34 = vpop.f32.mrb[1].mxu1 }
 0x204   :  { %v269_v35 = vpop.f32.mrb[2].mxu1 }
 0x205   :  { %v272_v36 = vmax.f32 %v267_v33, 0.0  ;;  %v483_v37 = vpop.f32.mrb[3].mxu1 }
 0x207   :  { %v275_v38 = vmul.f32 2.0, %v272_v36 }
 0x209   :  { %v433_v39 = vpack.c.bf16 %v275_v38, %v275_v38 }
 0x20b   :  { %501 = vmatmul.mubr.msk.bf16.vlgmr.msra.gmra.mrb[4].mxu0 %vm432_vm5, %v433_v39 }
 0x2de   :  { %v383_v41 = vpop.f32.mrb[4].mxu0 }
 0x2df   :  { %v384_v42 = vadd.f32 %v423_v40, %v383_v41  ;;  %v502_v43 = vpop.f32.mrb[5].mxu0 }
 0x2e0   :  { %v386_v44 = vpop.f32.mrb[6].mxu0 }
 0x2e1   :  { %389 = vst [vmem:[#allocation10] sm:$0xff] %v384_v42  ;;  %v503_v45 = vpop.f32.mrb[7].mxu0 }
 0x2e2   :  { %630 = shalt.err (!%p627_p8)
}
 0x2e3   :  { %s631_s6 = scalar_lea.hbm %s825_s9, 128 }
 0x2e4   :  { %p632_p9 = scmp.ne.s32.totalorder %s825_s9, %s631_s6  ;;  %p635_p10 = scmp.lt.u32.totalorder %s631_s6, %s825_s9 }
 0x2e6   :  { %p637_p11 = pnand %p635_p10, %p632_p9 }
 0x2e8   :  { %640 = shalt.err (!%p637_p11)
}
 0x2e9   :  { %399 = dma.vmem_to_hbm [thread:$0]  %s397_s22, 128, %s825_s9, [#allocation4]  }
 0x2ea   :  { %647 = dma.done.wait [#allocation4], 128  }
 0x2eb   :  { %648 = vsyncadd [#allocation4], 4294967168 }
 0x2ec   :  { %403 = vsyncpa [#allocation3], 1 }
 0x2ed   :  { %404 = vsyncpa [#allocation6], 1 }
 0x2ee   :  { %405 = vsyncpa [#allocation9], 1 }
 0x2ef   :  { %406 = vsyncpa [#allocation4], 1 }

</bundles_post_ra>
